<compile_context>
chip_gen: v7x
topology: tpu7x:2x2x1
jax: 0.10.0
libtpu: 0.0.40
codegen_flags: <defaults>
</compile_context>

<pallas_src>
import functools
import math

import jax
import jax.numpy as jnp
from jax.experimental import pallas as pl
from jax.experimental.pallas import tpu as pltpu


def _mlp_kernel(x_ref, w1_ref, b1_ref, w2_ref, b2_ref, w3_ref, b3_ref, o_ref,
                *, mxu_bf16: bool = False):
    # x_ref : (17, TBL)                         batch on lanes
    # w1    : (10, 17)   b1: (10, 1)
    # w2    : (5, 10)    b2: (5, 1)
    # w3    : (5, 1)     b3: (1, 1)             (5->1 layer kept on the VPU)
    # o_ref : (1, TBL)
    x = x_ref[...]
    w1 = w1_ref[...]
    w2 = w2_ref[...]
    if mxu_bf16:  # optional lower-precision MXU operands (f32 accumulate)
        x = x.astype(jnp.bfloat16)
        w1 = w1.astype(jnp.bfloat16)
        w2 = w2.astype(jnp.bfloat16)

    # Layer 1: (10,17) @ (17,TBL) on the MXU, f32 accumulate.
    h1 = jnp.dot(w1, x, preferred_element_type=jnp.float32) + b1_ref[...]
    h1 = jnp.maximum(h1, 0.0)
    if mxu_bf16:
        h1 = h1.astype(jnp.bfloat16)

    # Layer 2: (5,10) @ (10,TBL) on the MXU.
    h2 = jnp.dot(w2, h1, preferred_element_type=jnp.float32) + b2_ref[...]
    h2 = jnp.maximum(h2, 0.0)

    # Layer 3 (5 -> 1) on the VPU: broadcast the (5,1) weight column over the
    # batch lanes and sum the 5 rows -- no MXU push, no cross-lane reduce.
    h3 = jnp.sum(h2 * w3_ref[...], axis=0, keepdims=True) + b3_ref[...]

    o_ref[...] = h3.astype(o_ref.dtype)


def mymodel_forward(x, params, tbl: int = 2048, mxu_bf16: bool = False):
    """x: any shape with a leading batch dim whose trailing dims flatten to 17.

    params are in PyTorch nn.Linear layout: W (out, in), b stored as (out, 1).
    """
    b = x.shape[0]
    x2d = x.reshape(b, -1)                       # nn.Flatten()
    assert x2d.shape[1] == 17, f"expected 17 flattened features, got {x2d.shape[1]}"

    w1, b1, w2, b2, w3, b3 = params
    w3_col = w3.reshape(5, 1)                    # (1,5) row -> (5,1) column for the VPU path

    # Batch-lane tile: multiple of 256 (fills the v6e/v7x 256-wide MXU; 2x v5e
    # width), clamped so small batches don't over-pad.
    def _round_up(v, m):
        return ((v + m - 1) // m) * m

    tbl = max(256, min(tbl, _round_up(b, 256)))
    padded_b = _round_up(b, tbl)

    # One transposed copy of x: (B,17) -> (17, padded_B).  The transpose is
    # required by the batch-on-lanes layout; any batch padding is fused by XLA
    # into the same copy, so this is a single extra pass over x.
    if padded_b != b:
        xT = jnp.pad(x2d, ((0, padded_b - b), (0, 0))).T
    else:
        xT = x2d.T

    grid = (padded_b // tbl,)

    # Tiny parameters: full-array blocks with constant index_maps -> DMA'd once,
    # VMEM-resident across all grid steps.
    const = lambda a: pl.BlockSpec(a.shape, lambda i: (0,) * a.ndim)

    kernel = functools.partial(_mlp_kernel, mxu_bf16=mxu_bf16)

    outT = pl.pallas_call(
        kernel,
        out_shape=jax.ShapeDtypeStruct((1, padded_b), jnp.float32),
        grid=grid,
        in_specs=[
            pl.BlockSpec((17, tbl), lambda i: (0, i)),   # x^T: batch-tiled on lanes
            const(w1), const(b1),
            const(w2), const(b2),
            const(w3_col), const(b3),
        ],
        out_specs=pl.BlockSpec((1, tbl), lambda i: (0, i)),  # lane-dense output
        compiler_params=pltpu.CompilerParams(dimension_semantics=("parallel",)),
    )(xT, w1, b1, w2, b2, w3_col, b3)

    return outT[:, :b].T                          # (B, 1)


def init_params(key):
    """Deterministic init matching nn.Linear: W (out, in), b stored as (out, 1)."""
    ks = jax.random.split(key, 6)

    def linear(kw, kb, fan_in, fan_out):
        bound = 1.0 / math.sqrt(fan_in)
        w = jax.random.uniform(kw, (fan_out, fan_in), jnp.float32, -bound, bound)
        b = jax.random.uniform(kb, (fan_out, 1), jnp.float32, -bound, bound)
        return w, b

    w1, b1 = linear(ks[0], ks[1], 17, 10)
    w2, b2 = linear(ks[2], ks[3], 10, 5)
    w3, b3 = linear(ks[4], ks[5], 5, 1)
    return (w1, b1, w2, b2, w3, b3)


def _reference(x, params):
    w1, b1, w2, b2, w3, b3 = params
    xf = x.reshape(x.shape[0], -1)
    h = jnp.maximum(xf @ w1.T + b1.T, 0.0)
    h = jnp.maximum(h @ w2.T + b2.T, 0.0)
    return h @ w3.T + b3.T


if __name__ == "__main__":
    key = jax.random.PRNGKey(0)
    kx1, kx2, kx3, kp = jax.random.split(key, 4)
    params = init_params(kp)

    # Case 1: batch=8, input shape (8, 1, 17) -> Flatten -> (8, 17).
    x1 = jax.random.normal(kx1, (8, 1, 17), jnp.float32)
    out1 = jax.block_until_ready(mymodel_forward(x1, params))
    ref1 = _reference(x1, params)
    assert out1.shape == (8, 1)
    assert jnp.allclose(out1, ref1, atol=1e-5, rtol=1e-5)

    # Case 2: batch not a multiple of the lane tile -> exercises padding path.
    x2 = jax.random.normal(kx2, (20, 17), jnp.float32)
    out2 = jax.block_until_ready(mymodel_forward(x2, params))
    ref2 = _reference(x2, params)
    assert out2.shape == (20, 1)
    assert jnp.allclose(out2, ref2, atol=1e-5, rtol=1e-5)

    # Case 3: multi-tile grid (tbl=256, batch=300 -> 2 grid steps).
    x3 = jax.random.normal(kx3, (300, 17), jnp.float32)
    out3 = jax.block_until_ready(mymodel_forward(x3, params, tbl=256))
    ref3 = _reference(x3, params)
    assert out3.shape == (300, 1)
    assert jnp.allclose(out3, ref3, atol=1e-5, rtol=1e-5)

    print("KERNEL_OK")
</pallas_src>

<mosaic_0001>
module attributes {stable_mosaic.version = 11 : i64} {
  func.func @_mlp_kernel(%arg0: i32, %arg1: memref<17x256xf32, #tpu.memory_space<vmem>>, %arg2: memref<10x17xf32, #tpu.memory_space<vmem>>, %arg3: memref<10x1xf32, #tpu.memory_space<vmem>>, %arg4: memref<5x10xf32, #tpu.memory_space<vmem>>, %arg5: memref<5x1xf32, #tpu.memory_space<vmem>>, %arg6: memref<5x1xf32, #tpu.memory_space<vmem>>, %arg7: memref<1x1xf32, #tpu.memory_space<vmem>>, %arg8: memref<1x256xf32, #tpu.memory_space<vmem>>) attributes {dimension_semantics = [#tpu.dimension_semantics<parallel>], iteration_bounds = array<i64: 1>, scalar_prefetch = 0 : i64, scratch_operands = 0 : i64, tpu.core_type = #tpu.core_type<tc>, window_params = [{transform_indices = @transform_0, window_bounds = array<i64: 17, 256>}, {pipeline_mode = #tpu.pipeline_mode<synchronous>, transform_indices = @transform_1, window_bounds = array<i64: 10, 17>}, {pipeline_mode = #tpu.pipeline_mode<synchronous>, transform_indices = @transform_2, window_bounds = array<i64: 10, 1>}, {pipeline_mode = #tpu.pipeline_mode<synchronous>, transform_indices = @transform_3, window_bounds = array<i64: 5, 10>}, {pipeline_mode = #tpu.pipeline_mode<synchronous>, transform_indices = @transform_4, window_bounds = array<i64: 5, 1>}, {pipeline_mode = #tpu.pipeline_mode<synchronous>, transform_indices = @transform_5, window_bounds = array<i64: 5, 1>}, {pipeline_mode = #tpu.pipeline_mode<synchronous>, transform_indices = @transform_6, window_bounds = array<i64: 1, 1>}, {transform_indices = @transform_7, window_bounds = array<i64: 1, 256>}]} {
    %c0 = arith.constant 0 : index
    %c0_0 = arith.constant 0 : index
    %0 = vector.load %arg1[%c0, %c0_0] : memref<17x256xf32, #tpu.memory_space<vmem>>, vector<17x256xf32>
    %c0_1 = arith.constant 0 : index
    %c0_2 = arith.constant 0 : index
    %1 = vector.load %arg2[%c0_1, %c0_2] : memref<10x17xf32, #tpu.memory_space<vmem>>, vector<10x17xf32>
    %c0_3 = arith.constant 0 : index
    %c0_4 = arith.constant 0 : index
    %2 = vector.load %arg4[%c0_3, %c0_4] : memref<5x10xf32, #tpu.memory_space<vmem>>, vector<5x10xf32>
    %cst = arith.constant dense<0.000000e+00> : vector<10x256xf32>
    %3 = tpu.matmul %1, %0, %cst {dimension_numbers = #tpu.dot_dimension_numbers<[1], [0], [0], [1], [0, 0, 1, 1], [], []>} : vector<10x17xf32>, vector<17x256xf32>, vector<10x256xf32> -> vector<10x256xf32>
    %c0_5 = arith.constant 0 : index
    %c0_6 = arith.constant 0 : index
    %4 = vector.load %arg3[%c0_5, %c0_6] : memref<10x1xf32, #tpu.memory_space<vmem>>, vector<10x1xf32>
    %5 = vector.broadcast %4 : vector<10x1xf32> to vector<10x256xf32>
    %6 = arith.addf %3, %5 : vector<10x256xf32>
    %cst_7 = arith.constant 0.000000e+00 : f32
    %7 = vector.broadcast %cst_7 : f32 to vector<10x256xf32>
    %8 = arith.maximumf %6, %7 : vector<10x256xf32>
    %cst_8 = arith.constant dense<0.000000e+00> : vector<5x256xf32>
    %9 = tpu.matmul %2, %8, %cst_8 {dimension_numbers = #tpu.dot_dimension_numbers<[1], [0], [0], [1], [0, 0, 1, 1], [], []>} : vector<5x10xf32>, vector<10x256xf32>, vector<5x256xf32> -> vector<5x256xf32>
    %c0_9 = arith.constant 0 : index
    %c0_10 = arith.constant 0 : index
    %10 = vector.load %arg5[%c0_9, %c0_10] : memref<5x1xf32, #tpu.memory_space<vmem>>, vector<5x1xf32>
    %11 = vector.broadcast %10 : vector<5x1xf32> to vector<5x256xf32>
    %12 = arith.addf %9, %11 : vector<5x256xf32>
    %cst_11 = arith.constant 0.000000e+00 : f32
    %13 = vector.broadcast %cst_11 : f32 to vector<5x256xf32>
    %14 = arith.maximumf %12, %13 : vector<5x256xf32>
    %c0_12 = arith.constant 0 : index
    %c0_13 = arith.constant 0 : index
    %15 = vector.load %arg6[%c0_12, %c0_13] : memref<5x1xf32, #tpu.memory_space<vmem>>, vector<5x1xf32>
    %16 = vector.broadcast %15 : vector<5x1xf32> to vector<5x256xf32>
    %17 = arith.mulf %14, %16 : vector<5x256xf32>
    %cst_14 = arith.constant dense<0.000000e+00> : vector<256xf32>
    %18 = vector.multi_reduction <add>, %17, %cst_14 [0] : vector<5x256xf32> to vector<256xf32>
    %19 = vector.shape_cast %18 : vector<256xf32> to vector<1x256xf32>
    %c0_15 = arith.constant 0 : index
    %c0_16 = arith.constant 0 : index
    %20 = vector.load %arg7[%c0_15, %c0_16] : memref<1x1xf32, #tpu.memory_space<vmem>>, vector<1x1xf32>
    %21 = vector.broadcast %20 : vector<1x1xf32> to vector<1x256xf32>
    %22 = arith.addf %19, %21 : vector<1x256xf32>
    %c0_17 = arith.constant 0 : index
    %c0_18 = arith.constant 0 : index
    %23 = vector.load %arg8[%c0_17, %c0_18] : memref<1x256xf32, #tpu.memory_space<vmem>>, vector<1x256xf32>
    tpu.vector_store %arg8[%c0_17, %c0_18], %22 {strides = array<i32>} : memref<1x256xf32, #tpu.memory_space<vmem>>, vector<1x256xf32>,
    return
  }
  func.func @transform_0(%arg0: i32) -> (i32, i32) {
    %c0_i32 = arith.constant 0 : i32
    %c0_i32_0 = arith.constant 0 : i32
    return %c0_i32, %arg0 : i32, i32
  }
  func.func @transform_1(%arg0: i32) -> (i32, i32) {
    %c0_i32 = arith.constant 0 : i32
    %c0_i32_0 = arith.constant 0 : i32
    %c0_i32_1 = arith.constant 0 : i32
    return %c0_i32, %c0_i32_0 : i32, i32
  }
  func.func @transform_2(%arg0: i32) -> (i32, i32) {
    %c0_i32 = arith.constant 0 : i32
    %c0_i32_0 = arith.constant 0 : i32
    %c0_i32_1 = arith.constant 0 : i32
    return %c0_i32, %c0_i32_0 : i32, i32
  }
  func.func @transform_3(%arg0: i32) -> (i32, i32) {
    %c0_i32 = arith.constant 0 : i32
    %c0_i32_0 = arith.constant 0 : i32
    %c0_i32_1 = arith.constant 0 : i32
    return %c0_i32, %c0_i32_0 : i32, i32
  }
  func.func @transform_4(%arg0: i32) -> (i32, i32) {
    %c0_i32 = arith.constant 0 : i32
    %c0_i32_0 = arith.constant 0 : i32
    %c0_i32_1 = arith.constant 0 : i32
    return %c0_i32, %c0_i32_0 : i32, i32
  }
  func.func @transform_5(%arg0: i32) -> (i32, i32) {
    %c0_i32 = arith.constant 0 : i32
    %c0_i32_0 = arith.constant 0 : i32
    %c0_i32_1 = arith.constant 0 : i32
    return %c0_i32, %c0_i32_0 : i32, i32
  }
  func.func @transform_6(%arg0: i32) -> (i32, i32) {
    %c0_i32 = arith.constant 0 : i32
    %c0_i32_0 = arith.constant 0 : i32
    %c0_i32_1 = arith.constant 0 : i32
    return %c0_i32, %c0_i32_0 : i32, i32
  }
  func.func @transform_7(%arg0: i32) -> (i32, i32) {
    %c0_i32 = arith.constant 0 : i32
    %c0_i32_0 = arith.constant 0 : i32
    return %c0_i32, %arg0 : i32, i32
  }
}

</mosaic_0001>

<bundles_post_ra>
// kernel: tpu_custom_call.1
= control target key start
LH: loop header
LB: loop body
LE: loop exit
PB: predicated region body
PF: predicated region fallthrough
CT: control target
= control target key end

     0   :  { %s493_s0 = inlined_call_operand.hbm [shape: f32[17,256], index: 0, kind: input, shape index: {}]   ;;  %s494_s1 = inlined_call_operand.vmem [shape: f32[10,17], index: 1, kind: input, shape index: {}]   ;;  %s495_s2 = inlined_call_operand.vmem [shape: f32[10,1], index: 2, kind: input, shape index: {}]   ;;  %s496_s3 = inlined_call_operand.vmem [shape: f32[5,10], index: 3, kind: input, shape index: {}]   ;;  %s497_s4 = inlined_call_operand.vmem [shape: f32[5,1], index: 4, kind: input, shape index: {}]   ;;  %s498_s5 = inlined_call_operand.vmem [shape: f32[5,1], index: 5, kind: input, shape index: {}]   ;;  %s499_s6 = inlined_call_operand.<no memory space> [shape: f32[1,1], index: 6, kind: input, shape index: {}]   ;;  %s500_s7 = inlined_call_operand.hbm [shape: f32[1,256], index: 7, kind: output, shape index: {}]  }
   0x1   :  { %v12_v0 = vstv %s499_s6 }
   0x2   :  { %13 = vst [vmem:[#allocation2] sm:$0x1] %v12_v0 }
   0x3   :  { %14 = vsyncpa [#allocation4], 0 }
   0x4   :  { %15 = vsyncpa [#allocation5], 0  ;;  %s397_s26 = smov [#allocation3]   ;;  %s349_s30 = scalar_lea.hbm %s493_s0, 768 }
   0x5   :  { %s21_s27 = sshll.u32 %s397_s26, 4  ;;  %p350_p0 = scmp.ne.s32.totalorder %s493_s0, %s349_s30  ;;  %s22_s27 = int_to_ptr.vmem [resolvable:$true] %s21_s27 }
   0x6   :  { %p353_p1 = scmp.lt.u32.totalorder %s349_s30, %s493_s0 }
   0x8   :  { %p355_p2 = pnand %p353_p1, %p350_p0 }
   0xa   :  { %358 = shalt.err (!%p355_p2)
}
   0xb   :  { %s359_s6 = scalar_lea.vmem %s22_s27, 768  ;;  %p364_p4 = scmp.lt.s32.totalorder %s22_s27, %s22_s27 }
   0xc   :  { %p360_p3 = scmp.ne.s32.totalorder %s22_s27, %s359_s6  ;;  %p365_p5 = scmp.lt.s32.totalorder %s359_s6, %s359_s6 }
   0xe   :  { %p366_p6 = por %p365_p5, %p364_p4 }
  0x10   :  { %p367_p7 = pnand %p366_p6, %p360_p3 }
  0x12   :  { %370 = shalt.err (!%p367_p7)
}
  0x13   :  { %s398_s12 = smov 256   ;;  %s399_s13 = smov 16  }
  0x14   :  { %27 = dma.hbm_to_vmem [thread:$0]  %s493_s0, 768, %s22_s27, [#allocation4], %s398_s12, %s398_s12, %s399_s13  }
  0x15   :  { %393 = dma.done.wait [#allocation4], 768  }
  0x16   :  { %394 = vsyncadd [#allocation4], 4294966528  ;;  %v400_v1 = vmov 0.0   ;;  %v401_v2 = vmov 0   ;;  %v44_v3 = vld [vmem:[#allocation3 + $0x8] sm:$0xff]  ;;  %v46_v4 = vld [vmem:[#allocation3 + $0x18] sm:$0xff]  ;;  %v278_v44 = vlaneseq }
  0x17   :  { %142 = vmatprep.mubr.f32.mxu0 %v400_v1  ;;  %347 = vset.pattern.permute.xlu0 %v401_v2  ;;  %v43_v5 = vld [vmem:[#allocation3] sm:$0xff]  ;;  %v329_v6 = vpack.c.bf16 %v46_v4, %v44_v3  ;;  %v45_v7 = vld [vmem:[#allocation3 + $0x10] sm:$0xff]  ;;  %v48_v9 = vld [vmem:[#allocation3 + $0x28] sm:$0x1]  ;;  %vm71_vm0 = vcmask 1040384   ;;  %vm64_vm1 = vcmask 138240  }
  0x18   :  { %240 = vmatprep.mubr.f32.mxu1 %v400_v1  ;;  %348 = vset.pattern.permute.xlu1 %v401_v2  ;;  %v331_v8 = vpack.c.bf16 %v45_v7, %v43_v5  ;;  %v52_v10 = vld [vmem:[%s495_s2] sm:$0xff]  ;;  %v53_v11 = vld [vmem:[%s495_s2 + $0x8] sm:$0x3]  ;;  %vm169_vm2 = vcmask 1041408   ;;  %vm402_vm3 = vmmov 1   ;;  %vm165_vm5 = vcmask 80896  }
  0x19   :  { %330 = vmatprep.subr.bf16.mxu0 %v329_v6  ;;  %56 = vperm.xlu0 %347, %v52_v10   ;;  %v47_v12 = vld [vmem:[#allocation3 + $0x20] sm:$0x1]  ;;  %v272_v14 = vld [vmem:[#allocation2] sm:$0x1]  ;;  %v50_v15 = vld [vmem:[%s494_s1 + $0x8] sm:$0x3] }
  0x1a   :  { %332 = vmatpush1.bf16.msra.mxu0 %v331_v8  ;;  %v49_v13 = vld [vmem:[%s494_s1] sm:$0xff]  ;;  %vm334_vm4 = vmpackc.low %vm169_vm2, %vm402_vm3  ;;  %vm257_vm6 = vcmask 1044480   ;;  %v279_v50 = vshrl.u32 %v278_v44, 7  ;;  %v403_v54 = vmov 1966171168   ;;  %vm304_vm7 = vcmp.lt.s32.totalorder %v278_v44, 256 }
  0x1b   :  { %322 = vmatprep.subr.msk.mxu0 %vm71_vm0, %v48_v9  ;;  %v159_v16 = vld [vmem:[%s497_s4] sm:$0x1f]  ;;  %v288_v55 = vunpack.c.l.s4 %v403_v54 }
  0x1c   :  { %162 = vperm.xlu1 %348, %v159_v16   ;;  %v249_v17 = vld [vmem:[%s498_s5] sm:$0x1f]  ;;  %v280_v57 = vsub.s32 0, %v279_v50 }
  0x1d   :  { %61 = vperm.xlu0 %347, %v53_v11   ;;  %v51_v34 = vld [vmem:[%s496_s3] sm:$0x1f]  ;;  %v289_v62 = vunpack.c.0.s8 %v288_v55  ;;  %s404_s3 = smov [#allocation6]  }
  0x1e   :  { %323 = vmatpush1.msk.msra.mxu0 %vm71_vm0, %v47_v12  ;;  %s313_s5 = sshll.u32 %s404_s3, 4  ;;  %s314_s5 = int_to_ptr.vmem [resolvable:$true] %s313_s5 }
  0x1f   :  { %324 = vmatmul.mubr.msk.f32.vlgmr.msra.gmra.mrb[0].mxu0 %vm64_vm1, %v49_v13  ;;  %v292_v4 = vsub.s32 %v289_v62, %v279_v50  ;;  %s371_s26 = scalar_lea.vmem %s314_s5, 32  ;;  %p376_p9 = scmp.lt.s32.totalorder %s314_s5, %s314_s5 }
  0x20   :  { %148 = vmatprep.mubr.f32.mxu0 %v400_v1  ;;  %252 = vperm.xlu1 %348, %v249_v17   ;;  %p372_p8 = scmp.ne.s32.totalorder %s314_s5, %s371_s26  ;;  %p377_p10 = scmp.lt.s32.totalorder %s371_s26, %s371_s26 }
  0x21   :  { %275 = vperm.xlu0 %347, %v272_v14  }
  0x22   :  { %p378_p11 = por %p377_p10, %p376_p9 }
  0x23   :  { %325 = vmatmul.mubr.msk.f32.gmra.mrb[2].mxu0 %vm64_vm1, %v50_v15 }
  0x24   :  { %p379_p12 = pnand %p378_p11, %p372_p8 }
  0x98   :  { %v57_v18 = vpop.permute.xlu0 %56 }
  0x9b   :  { %v163_v35 = vpop.permute.xlu1 %162 }
  0x9c   :  { %v62_v22 = vpop.permute.xlu0 %61 }
  0x9f   :  { %v253_v41 = vpop.permute.xlu1 %252 }
  0xa0   :  { %v276_v59 = vpop.permute.xlu0 %275 }
  0xa1   :  { %v281_v0 = vrot.slane %v276_v59, %v280_v57 }
  0xf2   :  { %v144_v19 = vpop.f32.mrb[0].mxu0 }
  0xf3   :  { %v146_v20 = vpop.f32.mrb[1].mxu0  ;;  %v145_v21 = vadd.f32 %v144_v19, %v57_v18 }
  0xf4   :  { %v147_v23 = vadd.f32 %v146_v20, %v57_v18 }
  0xf5   :  { %v155_v28 = vmax.f32 %v145_v21, 0.0 }
  0xf6   :  { %v150_v24 = vpop.f32.mrb[2].mxu0  ;;  %v156_v30 = vmax.f32 %v147_v23, 0.0 }
  0xf7   :  { %v151_v25 = vadd.f32 %v150_v24, %v62_v22  ;;  %v152_v26 = vpop.f32.mrb[3].mxu0 }
  0xf8   :  { %v153_v27 = vadd.f32 %v152_v26, %v62_v22 }
  0xf9   :  { %v157_v29 = vmax.f32 %v151_v25, 0.0 }
  0xfa   :  { %v158_v31 = vmax.f32 %v153_v27, 0.0 }
  0xfb   :  { %v336_v32 = vpack.c.bf16 %v157_v29, %v155_v28 }
  0xfc   :  { %v333_v33 = vpack.c.bf16 %v158_v31, %v156_v30 }
  0xfe   :  { %335 = vmatprep.subr.msk.bf16.mxu1 %vm334_vm4, %v333_v33 }
  0xff   :  { %338 = vmatpush1.bf16.msk.msra.mxu1 %vm334_vm4, %v336_v32 }
 0x102   :  { %328 = vmatmul.mubr.msk.f32.vlgmr.msra.gmra.mrb[0].mxu1 %vm165_vm5, %v51_v34 }
 0x1d5   :  { %v242_v36 = vpop.f32.mrb[0].mxu1 }
 0x1d6   :  { %v243_v37 = vadd.f32 %v242_v36, %v163_v35  ;;  %v244_v38 = vpop.f32.mrb[1].mxu1 }
 0x1d7   :  { %v245_v39 = vadd.f32 %v244_v38, %v163_v35 }
 0x1d8   :  { %v247_v40 = vmax.f32 %v243_v37, 0.0 }
 0x1d9   :  { %v248_v42 = vmax.f32 %v245_v39, 0.0 }
 0x1da   :  { %v255_v43 = vmul.f32 %v253_v41, %v247_v40 }
 0x1db   :  { %v256_v45 = vmul.f32 %v253_v41, %v248_v42 }
 0x1dc   :  { %v258_v46 = vsel %vm257_vm6, %v255_v43, 0.0 }
 0x1dd   :  { %v259_v47 = vrot.slane %v258_v46, 4  ;;  %v265_v48 = vsel %vm257_vm6, %v256_v45, 0.0 }
 0x1de   :  { %v266_v49 = vrot.slane %v265_v48, 4 }
 0x1df   :  { %v260_v51 = vadd.f32 %v259_v47, %v258_v46 }
 0x1e0   :  { %v267_v52 = vadd.f32 %v266_v49, %v265_v48 }
 0x1e1   :  { %v261_v53 = vrot.slane %v260_v51, 2 }
 0x1e2   :  { %v268_v56 = vrot.slane %v267_v52, 2 }
 0x1e3   :  { %v262_v58 = vadd.f32 %v261_v53, %v260_v51 }
 0x1e4   :  { %v269_v60 = vadd.f32 %v268_v56, %v267_v52 }
 0x1e5   :  { %v263_v61 = vrot.slane %v262_v58, 1 }
 0x1e6   :  { %v270_v63 = vrot.slane %v269_v60, 1 }
 0x1e7   :  { %v264_v1 = vadd.f32 %v263_v61, %v262_v58 }
 0x1e8   :  { %v271_v2 = vadd.f32 %v270_v63, %v269_v60 }
 0x1e9   :  { %v282_v3 = vadd.f32 %v281_v0, %v264_v1 }
 0x1ea   :  { %v283_v5 = vadd.f32 %v281_v0, %v271_v2 }
 0x1ec   :  { %v286_v6 = vcombine.low %v282_v3, %v283_v5 }
 0x1ee   :  { %v293_v7 = vrot.slane %v286_v6, %v292_v4 }
 0x1f0   :  { %v300_v8 = vrot.slane %v293_v7, %v292_v4 }
 0x1f2   :  { %306 = vst.msk [vmem:[#allocation6] sm:$0x3] %vm304_vm7, %v300_v8 }
 0x1f3   :  { %382 = shalt.err (!%p379_p12)
}
 0x1f4   :  { %s383_s29 = scalar_lea.hbm %s500_s7, 32 }
 0x1f5   :  { %p384_p13 = scmp.ne.s32.totalorder %s500_s7, %s383_s29  ;;  %p387_p0 = scmp.lt.u32.totalorder %s383_s29, %s500_s7 }
 0x1f7   :  { %p389_p1 = pnand %p387_p0, %p384_p13 }
 0x1f9   :  { %392 = shalt.err (!%p389_p1)
}
 0x1fa   :  { %316 = dma.vmem_to_hbm [thread:$0]  %s314_s5, 32, %s500_s7, [#allocation5]  }
 0x1fb   :  { %395 = dma.done.wait [#allocation5], 32  }
 0x1fc   :  { %396 = vsyncadd [#allocation5], 4294967264 }
 0x1fd   :  { %320 = vsyncpa [#allocation4], 1 }
 0x1fe   :  { %321 = vsyncpa [#allocation5], 1 }

</bundles_post_ra>
